<compile_context>
chip_gen: v7x
topology: tpu7x:2x2x1
jax: 0.10.0
libtpu: 0.0.40
codegen_flags: <defaults>
</compile_context>

<pallas_src>
from functools import partial

import jax
import jax.numpy as jnp
from jax.experimental import pallas as pl
from jax.experimental.pallas import tpu as pltpu


def _dilated_residual_kernel(dilation, x_ref, mask_ref, wd_ref, bd_ref,
                             w1_ref, b1_ref, o_ref):
    """Per-batch-element body (channels on sublanes, time on lanes).

    x_ref:    (Cin, T)        input (also the residual operand)
    mask_ref: (1, T)          lane-dense mask
    wd_ref:   (3, Cout, Cin)  dilated-conv taps (LHS orientation)
    bd_ref:   (Cout, 1)       f32
    w1_ref:   (Cout, Cout)    1x1 conv weight (LHS orientation)
    b1_ref:   (Cout, 1)       f32
    o_ref:    (Cout, T)
    """
    Cin, T = x_ref.shape
    d = dilation

    x = x_ref[...]                                            # single VMEM load
    col = jax.lax.broadcasted_iota(jnp.int32, (Cin, T), 1)

    # tap 0 needs x[:, t - d] (zero for t < d):       roll right by d, mask wrap.
    x_l = jnp.where(col >= d, pltpu.roll(x, d % T, axis=1),
                    jnp.zeros((), x.dtype))
    # tap 2 needs x[:, t + d] (zero for t >= T - d):  roll left by d, mask wrap.
    x_r = jnp.where(col < T - d, pltpu.roll(x, (T - d) % T, axis=1),
                    jnp.zeros((), x.dtype))

    h = (jnp.dot(wd_ref[0], x_l, preferred_element_type=jnp.float32)
         + jnp.dot(wd_ref[1], x, preferred_element_type=jnp.float32)
         + jnp.dot(wd_ref[2], x_r, preferred_element_type=jnp.float32)
         + bd_ref[...])
    h = jnp.maximum(h, 0.0)                                   # ReLU (f32)

    out = jnp.dot(w1_ref[...], h.astype(x.dtype),
                  preferred_element_type=jnp.float32) + b1_ref[...]

    # TODO(synk): nn.Dropout is identity at inference; training-mode stochastic
    #             dropout is not applied here (would use pltpu.prng_* + mask).
    o_ref[...] = ((x + out) * mask_ref[...]).astype(o_ref.dtype)


def dilated_residual_layer(x_nct, mask_nt, w_dilated, b_dilated, w_1x1, b_1x1,
                           dilation):
    """x_nct: (N, Cin, T); mask_nt: (N, T); PyTorch Conv1d weight layouts.

    w_dilated: (Cout, Cin, 3), b_dilated: (Cout,)
    w_1x1:     (Cout, Cout, 1), b_1x1:    (Cout,)
    Returns (N, Cout, T).
    """
    N, Cin, T = x_nct.shape
    Cout = w_dilated.shape[0]
    if Cin != Cout:
        raise ValueError("residual add requires in_channels == out_channels "
                         f"(got Cin={Cin}, Cout={Cout})")
    d = int(dilation)
    act_dtype = x_nct.dtype

    mask = mask_nt[:, None, :].astype(act_dtype)              # (N, 1, T) lane-dense
    wd = jnp.transpose(w_dilated, (2, 0, 1)).astype(act_dtype)  # (3, Cout, Cin)
    bd = b_dilated.reshape(Cout, 1).astype(jnp.float32)
    w1 = w_1x1[:, :, 0].astype(act_dtype)                     # (Cout, Cout)
    b1 = b_1x1.reshape(Cout, 1).astype(jnp.float32)

    out = pl.pallas_call(
        partial(_dilated_residual_kernel, d),
        out_shape=jax.ShapeDtypeStruct((N, Cout, T), act_dtype),
        grid_spec=pltpu.PrefetchScalarGridSpec(
            num_scalar_prefetch=0,
            grid=(N,),
            in_specs=[
                pl.BlockSpec((pl.Squeezed(), Cin, T), lambda n: (n, 0, 0)),
                pl.BlockSpec((pl.Squeezed(), 1, T), lambda n: (n, 0, 0)),
                pl.BlockSpec((3, Cout, Cin), lambda n: (0, 0, 0)),
                pl.BlockSpec((Cout, 1), lambda n: (0, 0)),
                pl.BlockSpec((Cout, Cout), lambda n: (0, 0)),
                pl.BlockSpec((Cout, 1), lambda n: (0, 0)),
            ],
            out_specs=pl.BlockSpec((pl.Squeezed(), Cout, T), lambda n: (n, 0, 0)),
        ),
        compiler_params=pltpu.CompilerParams(
            dimension_semantics=("parallel",),
            vmem_limit_bytes=32 * 1024 * 1024,
        ),
    )(x_nct, mask, wd, bd, w1, b1)
    return out


def _reference(x_nct, mask_nt, w_dilated, b_dilated, w_1x1, b_1x1, dilation):
    """Pure-JAX reference matching the PyTorch forward (dropout in eval mode)."""
    out = jax.lax.conv_general_dilated(
        x_nct, w_dilated, window_strides=(1,), padding=[(dilation, dilation)],
        rhs_dilation=(dilation,), dimension_numbers=('NCH', 'OIH', 'NCH'))
    out = out + b_dilated[None, :, None]
    out = jnp.maximum(out, 0.0)
    out = jax.lax.conv_general_dilated(
        out, w_1x1, window_strides=(1,), padding=[(0, 0)],
        dimension_numbers=('NCH', 'OIH', 'NCH'))
    out = out + b_1x1[None, :, None]
    return (x_nct + out) * mask_nt[:, None, :]


if __name__ == "__main__":
    # Small deterministic example: batch=2, channels=4 (in == out, required by
    # the residual add), seq len=256 (lane-aligned). Two dilations exercise the
    # edge-padding mask logic.
    N, C, T = 2, 4, 256
    key = jax.random.PRNGKey(0)
    k1, k2, k3, k4, k5, k6 = jax.random.split(key, 6)

    x = jax.random.normal(k1, (N, C, T), dtype=jnp.float32)
    mask = (jax.random.uniform(k2, (N, T)) > 0.25).astype(jnp.float32)

    # Deterministic synthetic parameters (PyTorch Conv1d weight layouts).
    w_dilated = jax.random.normal(k3, (C, C, 3), dtype=jnp.float32) * 0.2
    b_dilated = jax.random.normal(k4, (C,), dtype=jnp.float32) * 0.1
    w_1x1 = jax.random.normal(k5, (C, C, 1), dtype=jnp.float32) * 0.2
    b_1x1 = jax.random.normal(k6, (C,), dtype=jnp.float32) * 0.1

    ok = True
    for dilation in (2, 8):
        out = dilated_residual_layer(x, mask, w_dilated, b_dilated, w_1x1,
                                     b_1x1, dilation)
        out = jax.block_until_ready(out)
        ref = _reference(x, mask, w_dilated, b_dilated, w_1x1, b_1x1, dilation)
        assert out.shape == (N, C, T)
        ok = ok and bool(jnp.allclose(out, ref, atol=1e-5, rtol=1e-5))
    assert ok, "mismatch vs reference"

    print("KERNEL_OK")
</pallas_src>

<mosaic_0001>
module attributes {stable_mosaic.version = 11 : i64} {
  func.func @_dilated_residual_kernel(%arg0: i32, %arg1: memref<1x4x256xf32, #tpu.memory_space<vmem>>, %arg2: memref<1x1x256xf32, #tpu.memory_space<vmem>>, %arg3: memref<3x4x4xf32, #tpu.memory_space<vmem>>, %arg4: memref<4x1xf32, #tpu.memory_space<vmem>>, %arg5: memref<4x4xf32, #tpu.memory_space<vmem>>, %arg6: memref<4x1xf32, #tpu.memory_space<vmem>>, %arg7: memref<1x4x256xf32, #tpu.memory_space<vmem>>) attributes {dimension_semantics = [#tpu.dimension_semantics<parallel>], iteration_bounds = array<i64: 2>, scalar_prefetch = 0 : i64, scratch_operands = 0 : i64, tpu.core_type = #tpu.core_type<tc>, window_params = [{transform_indices = @transform_0, window_bounds = array<i64: 1, 4, 256>}, {transform_indices = @transform_1, window_bounds = array<i64: 1, 1, 256>}, {pipeline_mode = #tpu.pipeline_mode<synchronous>, transform_indices = @transform_2, window_bounds = array<i64: 3, 4, 4>}, {pipeline_mode = #tpu.pipeline_mode<synchronous>, transform_indices = @transform_3, window_bounds = array<i64: 4, 1>}, {pipeline_mode = #tpu.pipeline_mode<synchronous>, transform_indices = @transform_4, window_bounds = array<i64: 4, 4>}, {pipeline_mode = #tpu.pipeline_mode<synchronous>, transform_indices = @transform_5, window_bounds = array<i64: 4, 1>}, {transform_indices = @transform_6, window_bounds = array<i64: 1, 4, 256>}]} {
    %c0 = arith.constant 0 : index
    %c0_0 = arith.constant 0 : index
    %c0_1 = arith.constant 0 : index
    %0 = vector.load %arg1[%c0, %c0_0, %c0_1] : memref<1x4x256xf32, #tpu.memory_space<vmem>>, vector<1x4x256xf32>
    %1 = vector.shape_cast %0 : vector<1x4x256xf32> to vector<4x256xf32>
    %2 = tpu.iota {dimensions = array<i32: 1>} : vector<4x256xi32>
    %c2_i32 = arith.constant 2 : i32
    %3 = vector.broadcast %c2_i32 : i32 to vector<4x256xi32>
    %4 = arith.cmpi sge, %2, %3 : vector<4x256xi32>
    %c2_i32_2 = arith.constant 2 : i32
    %5 = tpu.dynamic_rotate %1 by %c2_i32_2 dim 1 : vector<4x256xf32>, i32 -> vector<4x256xf32>
    %cst = arith.constant 0.000000e+00 : f32
    %6 = vector.broadcast %cst : f32 to vector<4x256xf32>
    %7 = arith.select %4, %5, %6 : vector<4x256xi1>, vector<4x256xf32>
    %c254_i32 = arith.constant 254 : i32
    %8 = vector.broadcast %c254_i32 : i32 to vector<4x256xi32>
    %9 = arith.cmpi slt, %2, %8 : vector<4x256xi32>
    %c254_i32_3 = arith.constant 254 : i32
    %10 = tpu.dynamic_rotate %1 by %c254_i32_3 dim 1 : vector<4x256xf32>, i32 -> vector<4x256xf32>
    %cst_4 = arith.constant 0.000000e+00 : f32
    %11 = vector.broadcast %cst_4 : f32 to vector<4x256xf32>
    %12 = arith.select %9, %10, %11 : vector<4x256xi1>, vector<4x256xf32>
    %c0_5 = arith.constant 0 : index
    %c0_6 = arith.constant 0 : index
    %c0_7 = arith.constant 0 : index
    %13 = vector.load %arg3[%c0_5, %c0_6, %c0_7] : memref<3x4x4xf32, #tpu.memory_space<vmem>>, vector<1x4x4xf32>
    %14 = vector.shape_cast %13 : vector<1x4x4xf32> to vector<4x4xf32>
    %cst_8 = arith.constant dense<0.000000e+00> : vector<4x256xf32>
    %15 = tpu.matmul %14, %7, %cst_8 {dimension_numbers = #tpu.dot_dimension_numbers<[1], [0], [0], [1], [0, 0, 1, 1], [], []>} : vector<4x4xf32>, vector<4x256xf32>, vector<4x256xf32> -> vector<4x256xf32>
    %c1 = arith.constant 1 : index
    %c0_9 = arith.constant 0 : index
    %c0_10 = arith.constant 0 : index
    %16 = vector.load %arg3[%c1, %c0_9, %c0_10] : memref<3x4x4xf32, #tpu.memory_space<vmem>>, vector<1x4x4xf32>
    %17 = vector.shape_cast %16 : vector<1x4x4xf32> to vector<4x4xf32>
    %cst_11 = arith.constant dense<0.000000e+00> : vector<4x256xf32>
    %18 = tpu.matmul %17, %1, %cst_11 {dimension_numbers = #tpu.dot_dimension_numbers<[1], [0], [0], [1], [0, 0, 1, 1], [], []>} : vector<4x4xf32>, vector<4x256xf32>, vector<4x256xf32> -> vector<4x256xf32>
    %19 = arith.addf %15, %18 : vector<4x256xf32>
    %c2 = arith.constant 2 : index
    %c0_12 = arith.constant 0 : index
    %c0_13 = arith.constant 0 : index
    %20 = vector.load %arg3[%c2, %c0_12, %c0_13] : memref<3x4x4xf32, #tpu.memory_space<vmem>>, vector<1x4x4xf32>
    %21 = vector.shape_cast %20 : vector<1x4x4xf32> to vector<4x4xf32>
    %cst_14 = arith.constant dense<0.000000e+00> : vector<4x256xf32>
    %22 = tpu.matmul %21, %12, %cst_14 {dimension_numbers = #tpu.dot_dimension_numbers<[1], [0], [0], [1], [0, 0, 1, 1], [], []>} : vector<4x4xf32>, vector<4x256xf32>, vector<4x256xf32> -> vector<4x256xf32>
    %23 = arith.addf %19, %22 : vector<4x256xf32>
    %c0_15 = arith.constant 0 : index
    %c0_16 = arith.constant 0 : index
    %24 = vector.load %arg4[%c0_15, %c0_16] : memref<4x1xf32, #tpu.memory_space<vmem>>, vector<4x1xf32>
    %25 = vector.broadcast %24 : vector<4x1xf32> to vector<4x256xf32>
    %26 = arith.addf %23, %25 : vector<4x256xf32>
    %cst_17 = arith.constant 0.000000e+00 : f32
    %27 = vector.broadcast %cst_17 : f32 to vector<4x256xf32>
    %28 = arith.maximumf %26, %27 : vector<4x256xf32>
    %c0_18 = arith.constant 0 : index
    %c0_19 = arith.constant 0 : index
    %29 = vector.load %arg5[%c0_18, %c0_19] : memref<4x4xf32, #tpu.memory_space<vmem>>, vector<4x4xf32>
    %cst_20 = arith.constant dense<0.000000e+00> : vector<4x256xf32>
    %30 = tpu.matmul %29, %28, %cst_20 {dimension_numbers = #tpu.dot_dimension_numbers<[1], [0], [0], [1], [0, 0, 1, 1], [], []>} : vector<4x4xf32>, vector<4x256xf32>, vector<4x256xf32> -> vector<4x256xf32>
    %c0_21 = arith.constant 0 : index
    %c0_22 = arith.constant 0 : index
    %31 = vector.load %arg6[%c0_21, %c0_22] : memref<4x1xf32, #tpu.memory_space<vmem>>, vector<4x1xf32>
    %32 = vector.broadcast %31 : vector<4x1xf32> to vector<4x256xf32>
    %33 = arith.addf %30, %32 : vector<4x256xf32>
    %34 = arith.addf %1, %33 : vector<4x256xf32>
    %c0_23 = arith.constant 0 : index
    %c0_24 = arith.constant 0 : index
    %c0_25 = arith.constant 0 : index
    %35 = vector.load %arg2[%c0_23, %c0_24, %c0_25] : memref<1x1x256xf32, #tpu.memory_space<vmem>>, vector<1x1x256xf32>
    %36 = vector.shape_cast %35 : vector<1x1x256xf32> to vector<1x256xf32>
    %37 = vector.broadcast %36 : vector<1x256xf32> to vector<4x256xf32>
    %38 = arith.mulf %34, %37 : vector<4x256xf32>
    %c0_26 = arith.constant 0 : index
    %c0_27 = arith.constant 0 : index
    %c0_28 = arith.constant 0 : index
    %39 = vector.load %arg7[%c0_26, %c0_27, %c0_28] : memref<1x4x256xf32, #tpu.memory_space<vmem>>, vector<1x4x256xf32>
    %40 = vector.shape_cast %39 : vector<1x4x256xf32> to vector<4x256xf32>
    %41 = vector.shape_cast %38 : vector<4x256xf32> to vector<1x4x256xf32>
    tpu.vector_store %arg7[%c0_26, %c0_27, %c0_28], %41 {strides = array<i32>} : memref<1x4x256xf32, #tpu.memory_space<vmem>>, vector<1x4x256xf32>,
    return
  }
  func.func @transform_0(%arg0: i32) -> (i32, i32, i32) {
    %c0_i32 = arith.constant 0 : i32
    %c0_i32_0 = arith.constant 0 : i32
    %c0_i32_1 = arith.constant 0 : i32
    return %arg0, %c0_i32, %c0_i32_0 : i32, i32, i32
  }
  func.func @transform_1(%arg0: i32) -> (i32, i32, i32) {
    %c0_i32 = arith.constant 0 : i32
    %c0_i32_0 = arith.constant 0 : i32
    %c0_i32_1 = arith.constant 0 : i32
    return %arg0, %c0_i32, %c0_i32_0 : i32, i32, i32
  }
  func.func @transform_2(%arg0: i32) -> (i32, i32, i32) {
    %c0_i32 = arith.constant 0 : i32
    %c0_i32_0 = arith.constant 0 : i32
    %c0_i32_1 = arith.constant 0 : i32
    %c0_i32_2 = arith.constant 0 : i32
    return %c0_i32, %c0_i32_0, %c0_i32_1 : i32, i32, i32
  }
  func.func @transform_3(%arg0: i32) -> (i32, i32) {
    %c0_i32 = arith.constant 0 : i32
    %c0_i32_0 = arith.constant 0 : i32
    %c0_i32_1 = arith.constant 0 : i32
    return %c0_i32, %c0_i32_0 : i32, i32
  }
  func.func @transform_4(%arg0: i32) -> (i32, i32) {
    %c0_i32 = arith.constant 0 : i32
    %c0_i32_0 = arith.constant 0 : i32
    %c0_i32_1 = arith.constant 0 : i32
    return %c0_i32, %c0_i32_0 : i32, i32
  }
  func.func @transform_5(%arg0: i32) -> (i32, i32) {
    %c0_i32 = arith.constant 0 : i32
    %c0_i32_0 = arith.constant 0 : i32
    %c0_i32_1 = arith.constant 0 : i32
    return %c0_i32, %c0_i32_0 : i32, i32
  }
  func.func @transform_6(%arg0: i32) -> (i32, i32, i32) {
    %c0_i32 = arith.constant 0 : i32
    %c0_i32_0 = arith.constant 0 : i32
    %c0_i32_1 = arith.constant 0 : i32
    return %arg0, %c0_i32, %c0_i32_0 : i32, i32, i32
  }
}

</mosaic_0001>

<bundles_post_ra>
// kernel: tpu_custom_call.1
= control target key start
LH: loop header
LB: loop body
LE: loop exit
PB: predicated region body
PF: predicated region fallthrough
CT: control target
= control target key end

     0   :  { %11 = vsyncpa [#allocation3], 0  ;;  %s1209_s0 = inlined_call_operand.hbm [shape: f32[2,4,256], index: 0, kind: input, shape index: {}]   ;;  %s1210_s1 = inlined_call_operand.vmem [shape: f32[2,1,256], index: 1, kind: input, shape index: {}]   ;;  %s1211_s2 = inlined_call_operand.vmem [shape: f32[3,4,4], index: 2, kind: input, shape index: {}]   ;;  %s1212_s3 = inlined_call_operand.vmem [shape: f32[4,1], index: 3, kind: input, shape index: {}]   ;;  %s1213_s4 = inlined_call_operand.vmem [shape: f32[4,4], index: 4, kind: input, shape index: {}]   ;;  %s1214_s5 = inlined_call_operand.vmem [shape: f32[4,1], index: 5, kind: input, shape index: {}]   ;;  %s1215_s6 = inlined_call_operand.hbm [shape: f32[2,4,256], index: 6, kind: output, shape index: {}]  }
   0x1   :  { %13 = vsyncpa [#allocation3 + $0x1], 0 }
   0x2   :  { %14 = vsyncpa [#allocation4], 0 }
   0x3   :  { %16 = vsyncpa [#allocation4 + $0x1], 0  ;;  %s1001_s21 = smov 0   ;;  %s1003_s22 = smov 0  }
   0x4   :  { %s1005_s23 = smov 0   ;;  %s1007_s24 = smov 0  }
   0x5 LB: > { %s1022_s25 = sadd.s32 4294967295, %s958_s24   ;;  %s774_s26 = sadd.s32 4294967294, %s958_s24   ;;  %s958_s24 = sphi %s1007_s24, %s1230_s24   ;;  %s954_s23 = sphi %s1005_s23, %s1229_s23   ;;  %s950_s22 = sphi %s1003_s22, %s1228_s22   ;;  %s946_s21 = sphi %s1001_s21, %s1227_s21  }
   0x6   : > { %s1026_s27 = sadd.s32 1, %s958_s24   ;;  %s29_s28 = sadd.s32 1, %s954_s23 }
   0x7   : > { %s26_s29 = ssub.s32 %s958_s24, %s1026_s27  ;;  %p36_p0 = scmp.ne.s32.totalorder %s954_s23, %s950_s22 }
   0x8   : > { %p27_p1 = scmp.eq.s32.totalorder %s26_s29, 0  ;;  %p37_p2 = scmp.eq.s32.totalorder %s958_s24, 0 }
   0x9   : > { %p42_p3 = scmp.ne.s32.totalorder %s950_s22, %s946_s21  ;;  %p43_p4 = scmp.eq.s32.totalorder %s1022_s25, 0 }
   0xa   : > { %s1038_s30 = scalar_select %p27_p1, %s954_s23, %s29_s28  }
   0xb   : > { %p1040_p5 = por %p37_p2, %p36_p0  ;;  %p1044_p6 = por %p43_p4, %p42_p3 }
   0xc   : > { %p176_p7 = scmp.eq.s32.totalorder %s1022_s25, 1  ;;  %p182_p8 = scmp.eq.s32.totalorder %s774_s26, 1 }
   0xd   : > { %p821_p10 = scmp.lt.s32.totalorder %s958_s24, 2  ;;  %s214_s11 = sand.u32 1, %s954_s23  }
   0xe   : > { %p1051_p11 = por %p176_p7, %p36_p0  ;;  %p1055_p12 = por %p182_p8, %p42_p3 }
   0xf   : > { %s803_s12 = sshll.u32 %s958_s24, 7  ;;  %s777_s13 = sshll.u32 %s214_s11, 3 }
  0x10   : > { %s1219_s9 = scalar_select %p1051_p11, 1, 0 }
  0x11   : > { %s1220_s10 = scalar_select %p1055_p12, 1, 0 }
  0x12   : > { %s1064_s16 = scalar_lea.hbm %s1209_s0, %s803_s12  ;;  %s218_s17 = scalar_lea.vmem [#allocation2], %s777_s13 }
  0x13   : > { %s226_s18 = sshll.u32 %s218_s17, 4  ;;  %p1068_p13 = pnand %p821_p10, %p1040_p5  ;;  %s1072_s18 = int_to_ptr.vmem [resolvable:$true] %s226_s18 }
  0x14   : > { %s215_s20 = scalar_lea.sflag [#allocation3], %s214_s11  ;;  %s862_s26 = scalar_lea.hbm %s1064_s16, 128 }
  0x15   : > { %p863_p2 = scmp.ne.s32.totalorder %s1064_s16, %s862_s26  ;;  %p864_p3 = pneg %p1068_p13 }
  0x16   : > { %s867_s7 = scalar_lea.hbm %s1209_s0, 256  ;;  %p868_p5 = scmp.lt.u32.totalorder %s1064_s16, %s1209_s0 }
  0x17   : > { %p865_p4 = pnand %p864_p3, %p863_p2  ;;  %p869_p8 = scmp.lt.u32.totalorder %s867_s7, %s862_s26 }
  0x18   : > { %p871_p9 = scmp.lt.u32.totalorder %s862_s26, %s1064_s16 }
  0x19   : > { %p866_p7 = pneg %p865_p4  ;;  %p870_p10 = por %p869_p8, %p868_p5 }
  0x1b   : > { %p872_p0 = por %p871_p9, %p870_p10 }
  0x1d   : > { %p873_p1 = pnand %p872_p0, %p866_p7 }
  0x1f   : > { %876 = shalt.err (!%p873_p1)
}
  0x20   : > { %s877_s11 = scalar_lea.vmem %s1072_s18, 128  ;;  %s960_s14 = smov [#allocation2]  }
  0x21   : > { %p878_p2 = scmp.ne.s32.totalorder %s1072_s18, %s877_s11  ;;  %s882_s15 = sshll.u32 %s960_s14, 4  ;;  %s883_s15 = int_to_ptr.vmem [resolvable:$false] %s882_s15 }
  0x22   : > { %s884_s17 = scalar_lea.vmem %s883_s15, 256  ;;  %p885_p11 = scmp.lt.s32.totalorder %s1072_s18, %s883_s15 }
  0x23   : > { %p880_p4 = pnand %p878_p2, %p864_p3  ;;  %p886_p5 = scmp.lt.s32.totalorder %s884_s17, %s877_s11 }
  0x25   : > { %p881_p12 = pneg %p880_p4  ;;  %p887_p8 = por %p886_p5, %p885_p11 }
  0x27   : > { %p888_p9 = pnand %p887_p8, %p881_p12 }
  0x29   : > { %891 = shalt.err (!%p888_p9)
}
  0x2a   : > { %816 = dma.hbm_to_vmem [thread:$0]  (!%p1068_p13), %s1064_s16, 128, %s1072_s18, %s215_s20  }
  0x2b   : > { %p1222_p0 = scmp.lt.s32.totalorder %s958_s24, 3  ;;  %p1223_p1 = scmp.ge.s32.totalorder %s958_s24, 1 }
  0x2d   : > { %p239_p3 = pnand %p1223_p1, %p1222_p0 }
  0x2e   : > { %s1106_s26 = sand.u32 (!%p239_p3), 1, %s950_s22  }
  0x2f   : > { %242 = sbr.rel (%p239_p3) target bundleno = 643 (0x283), region = 44  ;;  %s781_s28 = sshll.u32 (!%p239_p3), %s1106_s26, 3 }
  0x30   : > { %s245_s29 = scalar_lea.sflag (!%p239_p3), [#allocation3], %s1106_s26  ;;  %s248_s19 = scalar_lea.vmem (!%p239_p3), [#allocation2], %s781_s28 }
  0x36   : > { %937 = dma.done.wait (%p1044_p6), %s245_s29, 128  }
  0x37   : > { %939 = vsyncadd (%p1044_p6), %s245_s29, 4294967168  ;;  %v961_v0 = vmov 0.0   ;;  %v1116_v1 = vld [vmem:[%s248_s19] sm:$0xff]  ;;  %s962_s16 = smov 126   ;;  %s963_s18 = smov 2   ;;  %vm321_vm0 = vcmask 1043456   ;;  %v286_v6 = vlaneseq }
  0x38   : > { %470 = vmatprep.mubr.f32.mxu0 %v961_v0  ;;  %390 = vmatprep.mubr.f32.mxu1 %v961_v0  ;;  %v292_v2 = vcombine.high %v1116_v1, %v1116_v1  ;;  %v784_v3 = vld [vmem:[%s1211_s2 + $0x4] sm:$0xf]  ;;  %v964_v4 = vmov 0   ;;  %vm317_vm1 = vcmask 31744   ;;  %v561_v5 = vld [vmem:[%s1212_s3] sm:$0xf] }
  0x39   : > { %305 = vrot.lane.b32.xlu1 %v1116_v1, %s962_s16  ;;  %294 = vrot.lane.b32.xlu0 %v1116_v1, %s963_s18  ;;  %v287_v7 = vand.u32 127, %v286_v6  ;;  %v314_v16 = vld [vmem:[%s1211_s2] sm:$0xf]  ;;  %v791_v20 = vld [vmem:[%s1211_s2 + $0x8] sm:$0xf]  ;;  %p281_p6 = scmp.lt.s32.totalorder %s1022_s25, 1 }
  0x3a   : > { %785 = vmatprep.subr.msk.mxu1 %vm321_vm0, %v292_v2  ;;  %859 = vset.pattern.permute.xlu0 %v964_v4  ;;  %v572_v23 = vld [vmem:[%s1214_s5] sm:$0xf]  ;;  %v666_v34 = vshrl.u32 %v286_v6, 7  ;;  %s804_s13 = sshll.u32 %s1022_s25, 7  ;;  %s280_s11 = scalar_lea.vmem [#allocation5], %s781_s28 }
  0x3b   : > { %786 = vmatpush1.msk.msra.mxu1 %vm321_vm0, %v1116_v1  ;;  %860 = vset.pattern.permute.xlu1 %v964_v4  ;;  %v288_v8 = vadd.s32 128, %v287_v7  ;;  %vm309_vm2 = vcmp.lt.s32.totalorder %v287_v7, 126  ;;  %vm298_vm3 = vcmp.lt.s32.totalorder %v287_v7, 2  ;;  %vm289_vm5 = vcmp.ge.s32.totalorder %v287_v7, 2  ;;  %v571_v33 = vld [vmem:[%s1213_s4] sm:$0xf]  ;;  %s1165_s29 = scalar_lea.hbm %s1215_s6, %s804_s13 }
  0x3c   : > { %787 = vmatmul.mubr.msk.f32.vlgmr.msra.gmra.mrb[0].mxu1 %vm317_vm1, %v784_v3  ;;  %v667_v35 = vsub.s32 0, %v666_v34  ;;  %v671_v36 = vsub.s32 1, %v666_v34  ;;  %s692_s14 = sshll.u32 %s280_s11, 4  ;;  %s678_s19 = scalar_lea.sflag [#allocation4], %s1106_s26  ;;  %s1167_s14 = int_to_ptr.vmem [resolvable:$true] %s692_s14 }
  0x3d   : > { %307 = vrot.lane.b32.xlu1 %v292_v2, %s962_s16  ;;  %296 = vrot.lane.b32.xlu0 %v292_v2, %s963_s18  ;;  %vm304_vm4 = vcmp.lt.s32.totalorder %v288_v8, 254  ;;  %s282_s18 = scalar_select %p281_p6, %s1022_s25, 1 }
  0x3e   : > { %651 = vmatprep.mubr.f32.mxu1 %v961_v0  ;;  %s892_s16 = scalar_lea.vmem %s1167_s14, 128  ;;  %p1224_p12 = scmp.ne.s32.totalorder %s1219_s9, 0 }
  0x3f   : > { %s783_s20 = sshll.u32 %s282_s18, 1  ;;  %p893_p11 = scmp.ne.s32.totalorder %s1167_s14, %s892_s16 }
  0x40   : > { %s284_s12 = scalar_lea.vmem %s1210_s1, %s783_s20  ;;  %s965_s25 = smov [#allocation5]  }
  0x41   : > { %564 = vperm.xlu0 %859, %v561_v5   ;;  %575 = vperm.xlu1 %860, %v572_v23   ;;  %v663_v37 = vld [vmem:[%s284_s12] sm:$0x3]  ;;  %p894_p13 = pnand %p893_p11, %p1224_p12  ;;  %s896_s28 = sshll.u32 %s965_s25, 4  ;;  %s897_s28 = int_to_ptr.vmem [resolvable:$false] %s896_s28 }
  0x42   : > { %v668_v40 = vrot.slane %v663_v37, %v667_v35  ;;  %v672_v41 = vrot.slane %v663_v37, %v671_v36  ;;  %s898_s18 = scalar_lea.vmem %s897_s28, 256  ;;  %p899_p10 = scmp.lt.s32.totalorder %s1167_s14, %s897_s28 }
  0x43   : > { %p895_p7 = pneg %p894_p13  ;;  %p900_p2 = scmp.lt.s32.totalorder %s898_s18, %s892_s16 }
  0x44   : > { %v673_v46 = vcombine.low %v668_v40, %v672_v41 }
  0x45   : > { %p901_p4 = por %p900_p2, %p899_p10 }
  0x47   : > { %p902_p5 = pnand %p901_p4, %p895_p7 }
  0xab   : > { %v306_v9 = vpop.permute.xlu1 %305  ;;  %v295_v10 = vpop.permute.xlu0 %294 }
  0xaf   : > { %v308_v11 = vpop.permute.xlu1 %307  ;;  %v297_v12 = vpop.permute.xlu0 %296 }
  0xb0   : > { %v311_v13 = vsel %vm309_vm2, %v308_v11, %v306_v9  ;;  %v300_v14 = vsel %vm298_vm3, %v297_v12, %v295_v10  ;;  %v299_v15 = vsel %vm298_vm3, %v295_v10, %v297_v12  ;;  %v310_v17 = vsel %vm309_vm2, %v306_v9, %v308_v11 }
  0xb1   : > { %v313_v18 = vsel %vm304_vm4, %v311_v13, 0.0  ;;  %788 = vmatprep.subr.msk.mxu0 %vm321_vm0, %v299_v15  ;;  %v301_v19 = vsel %vm289_vm5, %v300_v14, 0.0 }
  0xb2   : > { %789 = vmatpush1.msk.msra.mxu0 %vm321_vm0, %v301_v19 }
  0xb3   : > { %790 = vmatmul.mubr.msk.f32.vlgmr.msra.gmra.mrb[0].mxu0 %vm317_vm1, %v314_v16  ;;  %792 = vmatprep.subr.msk.mxu0 %vm321_vm0, %v313_v18 }
  0xb4   : > { %793 = vmatpush1.msk.msra.mxu0 %vm321_vm0, %v310_v17  ;;  %552 = vmatprep.mubr.f32.mxu0 %v961_v0 }
  0xbb   : > { %794 = vmatmul.mubr.msk.f32.vlgmr.msra.gmra.mrb[0].mxu0 %vm317_vm1, %v791_v20 }
  0xc0   : > { %v565_v25 = vpop.permute.xlu0 %564  ;;  %v576_v38 = vpop.permute.xlu1 %575 }
 0x10f   : > { %v392_v21 = vpop.f32.mrb[0].mxu1 }
 0x110   : > { %v394_v22 = vpop.f32.mrb[1].mxu1 }
 0x18e   : > { %v554_v24 = vpop.f32.mrb[0].mxu0 }
 0x18f   : > { %v805_v26 = vadd.f32 %v554_v24, %v392_v21  ;;  %v556_v27 = vpop.f32.mrb[1].mxu0 }
 0x190   : > { %v806_v28 = vadd.f32 %v556_v27, %v394_v22 }
 0x191   : > { %v567_v29 = vadd.f32 %v805_v26, %v565_v25 }
 0x192   : > { %v568_v30 = vadd.f32 %v806_v28, %v565_v25 }
 0x193   : > { %v569_v32 = vmax.f32 %v567_v29, 0.0 }
 0x194   : > { %v570_v31 = vmax.f32 %v568_v30, 0.0 }
 0x196   : > { %795 = vmatprep.subr.msk.mxu1 %vm321_vm0, %v570_v31 }
 0x197   : > { %796 = vmatpush1.msk.msra.mxu1 %vm321_vm0, %v569_v32 }
 0x198   : > { %797 = vmatmul.mubr.msk.f32.vlgmr.msra.gmra.mrb[2].mxu1 %vm317_vm1, %v571_v33 }
 0x26b   : > { %v653_v39 = vpop.f32.mrb[2].mxu1 }
 0x26c   : > { %v654_v42 = vadd.f32 %v653_v39, %v576_v38  ;;  %v655_v43 = vpop.f32.mrb[3].mxu1 }
 0x26d   : > { %v656_v44 = vadd.f32 %v655_v43, %v576_v38 }
 0x26f   : > { %v660_v45 = vcombine.low %v654_v42, %v656_v44 }
 0x271   : > { %v662_v47 = vadd.f32 %v660_v45, %v1116_v1 }
 0x273   : > { %v675_v48 = vmul.f32 %v673_v46, %v662_v47 }
 0x275   : > { %676 = vst [vmem:[%s280_s11] sm:$0xff] %v675_v48 }
 0x276   : > { %905 = shalt.err (!%p902_p5)
}
 0x277   : > { %s906_s26 = scalar_lea.hbm %s1165_s29, 128  ;;  %s910_s7 = scalar_lea.hbm %s1215_s6, 256 }
 0x278   : > { %p907_p8 = scmp.ne.s32.totalorder %s1165_s29, %s906_s26  ;;  %p911_p1 = scmp.lt.u32.totalorder %s1165_s29, %s1215_s6 }
 0x279   : > { %p912_p3 = scmp.lt.u32.totalorder %s910_s7, %s906_s26  ;;  %p914_p11 = scmp.lt.u32.totalorder %s906_s26, %s1165_s29 }
 0x27a   : > { %p908_p9 = pnand %p907_p8, %p1224_p12 }
 0x27b   : > { %p913_p6 = por %p912_p3, %p911_p1 }
 0x27c   : > { %p909_p0 = pneg %p908_p9 }
 0x27d   : > { %p915_p13 = por %p914_p11, %p913_p6 }
 0x27f   : > { %p916_p7 = pnand %p915_p13, %p909_p0 }
 0x281   : > { %919 = shalt.err (!%p916_p7)
}
 0x282   : > { %811 = dma.vmem_to_hbm [thread:$0]  (%p1224_p12), %s1167_s14, 128, %s1165_s29, %s678_s19  }
 0x283 PF: > { %s704_s11 = sand.u32 1, %s946_s21   ;;  %p1225_p10 = scmp.ne.s32.totalorder %s1220_s10, 0 }
 0x284   : > { %p1226_p2 = scmp.ge.s32.totalorder %s958_s24, 2  ;;  %s705_s15 = scalar_lea.sflag [#allocation4], %s704_s11 }
 0x286   : > { %p818_p4 = pnand %p1226_p2, %p1225_p10 }
 0x288   : > { %941 = dma.done.wait (!%p818_p4), %s705_s15, 128  }
 0x289   : > { %943 = vsyncadd (!%p818_p4), %s705_s15, 4294967168  ;;  %p19_p5 = scmp.ge.s32.totalorder %s1026_s27, 4   ;;  %s1227_s21 = smov %s950_s22 }
 0x28a   : > { %s1228_s22 = smov %s954_s23  ;;  %s1229_s23 = smov %s1038_s30 }
 0x28b   : > { %s1230_s24 = smov %s1026_s27  ;;  %21 = sbr.rel (!%p19_p5) target bundleno = 5 (0x5), region = 94 }
 0x292   :  { %710 = vsyncpa [#allocation3], 1 }
 0x293   :  { %712 = vsyncpa [#allocation3 + $0x1], 1 }
 0x294   :  { %713 = vsyncpa [#allocation4], 1 }
 0x295   :  { %715 = vsyncpa [#allocation4 + $0x1], 1 }

</bundles_post_ra>
